<compile_context>
chip_gen: v6e
topology: v6e:2x2x1
jax: 0.10.0
libtpu: 0.0.40
codegen_flags: <defaults>
</compile_context>

<pallas_src>
import functools

import jax
import jax.numpy as jnp
from jax.experimental import pallas as pl
from jax.experimental.pallas import tpu as pltpu

LN_EPS = 1e-5  # torch.nn.LayerNorm default


def _round_up(a, b):
    return (a + b - 1) // b * b


@functools.lru_cache(maxsize=None)
def _vmem_capacity_bytes():
    """Per-core VMEM capacity; conservative 64 MiB (v7x-safe) if query fails."""
    try:
        return int(pltpu.get_tpu_info().vmem_capacity_bytes)
    except Exception:
        return 64 * 1024 * 1024


def _largest_divisor_tile(total, upper, step=128):
    """Largest multiple of `step` that divides `total` and is <= `upper`."""
    t = max(step, (min(upper, total) // step) * step)
    while total % t:
        t -= step
    return t


def _layer_norm(y, gamma, beta, d_real, d_pad, eps):
    """LayerNorm over the real d_real features of a (rows, d_pad) slab.

    Padded lanes of `y` are exactly zero by construction (zero-padded W2
    columns / b2 / x), so the mean only needs 1/d_real scaling; the variance
    additionally needs the padded lanes of the centered value masked to zero.
    """
    inv_d = 1.0 / d_real
    mean = jnp.sum(y, axis=-1, keepdims=True) * inv_d
    c = y - mean
    if d_pad != d_real:
        lane = jax.lax.broadcasted_iota(jnp.int32, (1, d_pad), 1)
        c = jnp.where(lane < d_real, c, 0.0)
    var = jnp.sum(c * c, axis=-1, keepdims=True) * inv_d
    return c * jax.lax.rsqrt(var + eps) * gamma + beta


# --------------------------------------------------------------------------- #
# Kernels
# --------------------------------------------------------------------------- #
def _make_resident_kernel(D, Dp, Hp, HK, nh, ln_eps):
    """Weights fully VMEM-resident; grid runs over row tiles only."""

    def kernel(x_ref, w1_ref, b1_ref, w2_ref, b2_ref, g_ref, be_ref, o_ref):
        x = x_ref[...]                              # (TM, Dp) f32
        x_bf = x.astype(jnp.bfloat16)               # MXU operand

        def chunk(k_start, acc):
            # fc1 chunk + ReLU (bf16 x bf16 -> f32 accumulate on the MXU)
            w1c = w1_ref[:, pl.ds(k_start, HK)]                      # (Dp, HK) bf16
            b1c = b1_ref[:, pl.ds(k_start, HK)]                      # (1, HK) f32
            h = jnp.dot(x_bf, w1c, preferred_element_type=jnp.float32) + b1c
            h = jnp.maximum(h, 0.0).astype(jnp.bfloat16)
            # fc2 chunk, f32 accumulation
            w2c = w2_ref[pl.ds(k_start, HK), :]                      # (HK, Dp) bf16
            part = jnp.dot(h, w2c, preferred_element_type=jnp.float32)
            return part if acc is None else acc + part

        if nh <= 8:
            # Fully unrolled: lets the scheduler overlap chunk k's fc2 MXU
            # pushes with chunk k+1's bias/ReLU/cast VPU work.
            acc = None
            for k in range(nh):
                acc = chunk(k * HK, acc)
        else:
            acc = jax.lax.fori_loop(
                0, nh,
                lambda k, a: chunk(pl.multiple_of(k * HK, HK), a),
                jnp.zeros(x.shape, jnp.float32),
                unroll=2)

        # dropout(p=0.0) is the identity; bias + residual in f32.
        # TODO(synk): dropout with p>0 would need pltpu.prng_*; module default is 0.0.
        y = acc + x + b2_ref[...]
        o_ref[...] = _layer_norm(y, g_ref[...], be_ref[...], D, Dp, ln_eps)

    return kernel


def _make_streamed_kernel(D, Dp, ln_eps):
    """Weights streamed over a second ("arbitrary") H grid axis; accumulate in VMEM."""

    def kernel(x_ref, w1_ref, b1_ref, w2_ref, b2_ref, g_ref, be_ref, o_ref, acc_ref):
        h_idx = pl.program_id(1)

        @pl.when(h_idx == 0)
        def _():
            acc_ref[...] = jnp.zeros_like(acc_ref)

        x = x_ref[...]                              # (TM, Dp) f32, re-used across H
        x_bf = x.astype(jnp.bfloat16)
        h = jnp.dot(x_bf, w1_ref[...], preferred_element_type=jnp.float32) + b1_ref[...]
        h = jnp.maximum(h, 0.0).astype(jnp.bfloat16)
        acc_ref[...] += jnp.dot(h, w2_ref[...], preferred_element_type=jnp.float32)

        @pl.when(h_idx == pl.num_programs(1) - 1)
        def _():
            y = acc_ref[...] + x + b2_ref[...]
            o_ref[...] = _layer_norm(y, g_ref[...], be_ref[...], D, Dp, ln_eps)

    return kernel


# --------------------------------------------------------------------------- #
# Wrapper
# --------------------------------------------------------------------------- #
def prepare_params(w1, b1, w2, b2, gamma, beta):
    """Pad params to TPU-friendly shapes and cast weights to bf16 ONCE.

    Hoisted out of the per-call path (perf review): repeated forward calls no
    longer pay the ~6*D*H bytes of pad/cast HBM traffic per call.
    Zero padding is an exact no-op through the whole pipeline.
    """
    D, H = w1.shape
    Dp = _round_up(D, 128)
    Hp = _round_up(H, 128) if H <= 2048 else _round_up(H, 1024)
    w1p = jnp.pad(jnp.asarray(w1, jnp.float32),
                  ((0, Dp - D), (0, Hp - H))).astype(jnp.bfloat16)
    w2p = jnp.pad(jnp.asarray(w2, jnp.float32),
                  ((0, Hp - H), (0, Dp - D))).astype(jnp.bfloat16)
    b1p = jnp.pad(jnp.asarray(b1, jnp.float32), (0, Hp - H)).reshape(1, Hp)
    b2p = jnp.pad(jnp.asarray(b2, jnp.float32), (0, Dp - D)).reshape(1, Dp)
    g2d = jnp.pad(jnp.asarray(gamma, jnp.float32), (0, Dp - D)).reshape(1, Dp)
    be2d = jnp.pad(jnp.asarray(beta, jnp.float32), (0, Dp - D)).reshape(1, Dp)
    return w1p, b1p, w2p, b2p, g2d, be2d


@jax.jit
def position_wise_feed_forward(x, w1p, b1p, w2p, b2p, g2d, be2d):
    """x: (B, S, D) float32; padded params from prepare_params(). Returns (B, S, D)."""
    B, S, D = x.shape
    Dp, Hp = w1p.shape
    M = B * S

    # ---- generation-aware sizing (all static at trace time) -------------------
    capacity = _vmem_capacity_bytes()
    budget = min(int(capacity * 0.70), 100 << 20)
    tm_cap = 1024 if capacity >= (96 << 20) else 512

    # H chunk for the resident path (largest multiple of 128 <= 1024 dividing Hp,
    # or the whole hidden dim if it is small enough).
    HK = Hp if Hp <= 2048 else _largest_divisor_tile(Hp, 1024)
    nh = Hp // HK

    def resident_fp(tm):
        w = 2 * 2 * 2 * Dp * Hp                  # 2 weight mats, double-buffered, bf16
        small = 2 * 4 * (Hp + 3 * Dp)            # biases + LN params (f32)
        xo = 2 * 2 * tm * Dp * 4                 # x + out row tiles, double-buffered f32
        inter = tm * HK * 6 + tm * Dp * 6        # h chunk (f32 + bf16) + f32 accumulator
        return w + small + xo + inter

    def streamed_fp(tm, th):
        w = 2 * 2 * 2 * Dp * th                  # streamed weight chunks, double-buffered
        small = 2 * 4 * (th + 3 * Dp)
        xo = 2 * 2 * tm * Dp * 4
        inter = tm * th * 6 + tm * Dp * 6 + tm * Dp * 4   # + VMEM accumulator scratch
        return w + small + xo + inter

    def pick_tm():
        tm = min(tm_cap, _round_up(M, 8))
        if M >= 32:  # keep >= ~4 row steps for megacore sharding + DMA overlap
            tm = min(tm, max(8, _round_up(-(-M // 4), 8)))
        return tm

    def shrink_tm(tm, floor):
        return max(floor, max(8, ((tm // 2) // 8) * 8))

    TM = pick_tm()
    tm_floor = min(256, TM)                      # never starve the MXU M dimension
    while TM > tm_floor and resident_fp(TM) > budget:
        TM = shrink_tm(TM, tm_floor)
    use_streamed = resident_fp(TM) > budget

    TH = Hp
    if use_streamed:
        # Weights do not fit VMEM-resident (e.g. large D*H on v7x's 64 MiB/TC):
        # stream them over an H grid axis instead of shrinking TM to nothing.
        TM = pick_tm()
        TH = _largest_divisor_tile(Hp, 1024)
        while TH > 128 and streamed_fp(TM, TH) > budget:
            TH = _largest_divisor_tile(Hp, TH - 128)
        while TM > 8 and streamed_fp(TM, TH) > budget:
            TM = shrink_tm(TM, 8)

    Mp = _round_up(M, TM)
    fp = streamed_fp(TM, TH) if use_streamed else resident_fp(TM)
    vmem_limit = int(max(32 << 20, min(capacity - (2 << 20), fp + (6 << 20))))

    # ---- pad activations only (weights were prepared once) --------------------
    x2d = jnp.pad(x.reshape(M, D), ((0, Mp - M), (0, Dp - D)))

    cost = pl.CostEstimate(
        flops=4 * M * Dp * Hp,                   # two matmuls, 2*M*D*H each
        transcendentals=M,                       # one rsqrt per row
        bytes_accessed=2 * M * Dp * 4 + 2 * Dp * Hp * 2 + (Hp + 3 * Dp) * 4,
    )

    if not use_streamed:
        row_spec = pl.BlockSpec((TM, Dp), lambda i: (i, 0))
        resident = lambda shape: pl.BlockSpec(shape, lambda i: (0,) * len(shape))
        out2d = pl.pallas_call(
            _make_resident_kernel(D, Dp, Hp, HK, nh, LN_EPS),
            out_shape=jax.ShapeDtypeStruct((Mp, Dp), jnp.float32),
            grid=(Mp // TM,),
            in_specs=[
                row_spec,                 # x tile (TM, Dp)
                resident((Dp, Hp)),       # W1 (bf16), VMEM-resident
                resident((1, Hp)),        # b1
                resident((Hp, Dp)),       # W2 (bf16), VMEM-resident
                resident((1, Dp)),        # b2
                resident((1, Dp)),        # gamma
                resident((1, Dp)),        # beta
            ],
            out_specs=row_spec,
            input_output_aliases={0: 0},  # rows are read before being overwritten
            compiler_params=pltpu.CompilerParams(
                dimension_semantics=("parallel",),
                vmem_limit_bytes=vmem_limit),
            cost_estimate=cost,
        )(x2d, w1p, b1p, w2p, b2p, g2d, be2d)
    else:
        n_h_steps = Hp // TH
        row_map = lambda i, h: (i, 0)
        const_map = lambda i, h: (0, 0)
        out2d = pl.pallas_call(
            _make_streamed_kernel(D, Dp, LN_EPS),
            out_shape=jax.ShapeDtypeStruct((Mp, Dp), jnp.float32),
            grid=(Mp // TM, n_h_steps),
            in_specs=[
                pl.BlockSpec((TM, Dp), row_map),          # x tile
                pl.BlockSpec((Dp, TH), lambda i, h: (0, h)),  # W1 chunk (streamed)
                pl.BlockSpec((1, TH), lambda i, h: (0, h)),   # b1 chunk
                pl.BlockSpec((TH, Dp), lambda i, h: (h, 0)),  # W2 chunk (streamed)
                pl.BlockSpec((1, Dp), const_map),         # b2
                pl.BlockSpec((1, Dp), const_map),         # gamma
                pl.BlockSpec((1, Dp), const_map),         # beta
            ],
            out_specs=pl.BlockSpec((TM, Dp), row_map),
            scratch_shapes=[pltpu.VMEM((TM, Dp), jnp.float32)],
            input_output_aliases={0: 0},
            compiler_params=pltpu.CompilerParams(
                dimension_semantics=("parallel", "arbitrary"),
                vmem_limit_bytes=vmem_limit),
            cost_estimate=cost,
        )(x2d, w1p, b1p, w2p, b2p, g2d, be2d)

    return out2d[:M, :D].reshape(B, S, D)


def init_params(key, dim_model, hidden):
    """Deterministic synthetic params mimicking nn.Linear / nn.LayerNorm shapes."""
    k1, k2, k3, k4 = jax.random.split(key, 4)
    lim1 = 1.0 / (dim_model ** 0.5)
    lim2 = 1.0 / (hidden ** 0.5)
    # stored as (in_features, out_features) == transpose of torch's (out, in)
    w1 = jax.random.uniform(k1, (dim_model, hidden), jnp.float32, -lim1, lim1)
    b1 = jax.random.uniform(k2, (hidden,), jnp.float32, -lim1, lim1)
    w2 = jax.random.uniform(k3, (hidden, dim_model), jnp.float32, -lim2, lim2)
    b2 = jax.random.uniform(k4, (dim_model,), jnp.float32, -lim2, lim2)
    gamma = jnp.ones((dim_model,), jnp.float32)   # LayerNorm weight init
    beta = jnp.zeros((dim_model,), jnp.float32)   # LayerNorm bias init
    return w1, b1, w2, b2, gamma, beta


if __name__ == "__main__":
    batch, seq, dim_model, hidden = 2, 8, 32, 64

    key = jax.random.PRNGKey(0)
    kx, kp = jax.random.split(key)
    x = jax.random.normal(kx, (batch, seq, dim_model), jnp.float32)
    w1, b1, w2, b2, gamma, beta = init_params(kp, dim_model, hidden)

    # One-time weight pad / bf16 cast (hoisted out of the per-call path).
    prepared = prepare_params(w1, b1, w2, b2, gamma, beta)

    out = position_wise_feed_forward(x, *prepared)
    out = jax.block_until_ready(out)

    # Reference using the same bf16-operand / f32-accumulate matmul path.
    x2d = x.reshape(-1, dim_model)
    h = jnp.maximum(
        jnp.dot(x2d.astype(jnp.bfloat16), w1.astype(jnp.bfloat16),
                preferred_element_type=jnp.float32) + b1, 0.0)
    y = jnp.dot(h.astype(jnp.bfloat16), w2.astype(jnp.bfloat16),
                preferred_element_type=jnp.float32) + b2 + x2d
    mean = jnp.mean(y, axis=-1, keepdims=True)
    var = jnp.mean((y - mean) ** 2, axis=-1, keepdims=True)
    ref = ((y - mean) * jax.lax.rsqrt(var + LN_EPS) * gamma + beta).reshape(x.shape)

    assert jnp.allclose(out, ref, atol=1e-3, rtol=1e-3), "mismatch vs reference"
    print("KERNEL_OK")
</pallas_src>

<mosaic_0001>
module attributes {stable_mosaic.version = 11 : i64} {
  func.func @kernel(%arg0: i32, %arg1: memref<16x128xf32, #tpu.memory_space<vmem>>, %arg2: memref<128x128xbf16, #tpu.memory_space<vmem>>, %arg3: memref<1x128xf32, #tpu.memory_space<vmem>>, %arg4: memref<128x128xbf16, #tpu.memory_space<vmem>>, %arg5: memref<1x128xf32, #tpu.memory_space<vmem>>, %arg6: memref<1x128xf32, #tpu.memory_space<vmem>>, %arg7: memref<1x128xf32, #tpu.memory_space<vmem>>, %arg8: memref<16x128xf32, #tpu.memory_space<vmem>>) attributes {dimension_semantics = [#tpu.dimension_semantics<parallel>], iteration_bounds = array<i64: 1>, scalar_prefetch = 0 : i64, scratch_operands = 0 : i64, tpu.core_type = #tpu.core_type<tc>, window_params = [{transform_indices = @transform_0, window_bounds = array<i64: 16, 128>}, {pipeline_mode = #tpu.pipeline_mode<synchronous>, transform_indices = @transform_1, window_bounds = array<i64: 128, 128>}, {pipeline_mode = #tpu.pipeline_mode<synchronous>, transform_indices = @transform_2, window_bounds = array<i64: 1, 128>}, {pipeline_mode = #tpu.pipeline_mode<synchronous>, transform_indices = @transform_3, window_bounds = array<i64: 128, 128>}, {pipeline_mode = #tpu.pipeline_mode<synchronous>, transform_indices = @transform_4, window_bounds = array<i64: 1, 128>}, {pipeline_mode = #tpu.pipeline_mode<synchronous>, transform_indices = @transform_5, window_bounds = array<i64: 1, 128>}, {pipeline_mode = #tpu.pipeline_mode<synchronous>, transform_indices = @transform_6, window_bounds = array<i64: 1, 128>}, {transform_indices = @transform_7, window_bounds = array<i64: 16, 128>}]} {
    %c0 = arith.constant 0 : index
    %c0_0 = arith.constant 0 : index
    %0 = vector.load %arg1[%c0, %c0_0] : memref<16x128xf32, #tpu.memory_space<vmem>>, vector<16x128xf32>
    %1 = arith.truncf %0 : vector<16x128xf32> to vector<16x128xbf16>
    %c0_1 = arith.constant 0 : index
    %c0_2 = arith.constant 0 : index
    %2 = vector.load %arg2[%c0_1, %c0_2] : memref<128x128xbf16, #tpu.memory_space<vmem>>, vector<128x128xbf16>
    %c0_3 = arith.constant 0 : index
    %c0_4 = arith.constant 0 : index
    %3 = vector.load %arg3[%c0_3, %c0_4] : memref<1x128xf32, #tpu.memory_space<vmem>>, vector<1x128xf32>
    %cst = arith.constant dense<0.000000e+00> : vector<16x128xf32>
    %4 = tpu.matmul %1, %2, %cst {dimension_numbers = #tpu.dot_dimension_numbers<[1], [0], [0], [1], [0, 0, 1, 1], [], []>} : vector<16x128xbf16>, vector<128x128xbf16>, vector<16x128xf32> -> vector<16x128xf32>
    %5 = vector.broadcast %3 : vector<1x128xf32> to vector<16x128xf32>
    %6 = arith.addf %4, %5 : vector<16x128xf32>
    %cst_5 = arith.constant 0.000000e+00 : f32
    %7 = vector.broadcast %cst_5 : f32 to vector<16x128xf32>
    %8 = arith.maximumf %6, %7 : vector<16x128xf32>
    %9 = arith.truncf %8 : vector<16x128xf32> to vector<16x128xbf16>
    %c0_6 = arith.constant 0 : index
    %c0_7 = arith.constant 0 : index
    %10 = vector.load %arg4[%c0_6, %c0_7] : memref<128x128xbf16, #tpu.memory_space<vmem>>, vector<128x128xbf16>
    %cst_8 = arith.constant dense<0.000000e+00> : vector<16x128xf32>
    %11 = tpu.matmul %9, %10, %cst_8 {dimension_numbers = #tpu.dot_dimension_numbers<[1], [0], [0], [1], [0, 0, 1, 1], [], []>} : vector<16x128xbf16>, vector<128x128xbf16>, vector<16x128xf32> -> vector<16x128xf32>
    %12 = arith.addf %11, %0 : vector<16x128xf32>
    %c0_9 = arith.constant 0 : index
    %c0_10 = arith.constant 0 : index
    %13 = vector.load %arg5[%c0_9, %c0_10] : memref<1x128xf32, #tpu.memory_space<vmem>>, vector<1x128xf32>
    %14 = vector.broadcast %13 : vector<1x128xf32> to vector<16x128xf32>
    %15 = arith.addf %12, %14 : vector<16x128xf32>
    %c0_11 = arith.constant 0 : index
    %c0_12 = arith.constant 0 : index
    %16 = vector.load %arg6[%c0_11, %c0_12] : memref<1x128xf32, #tpu.memory_space<vmem>>, vector<1x128xf32>
    %c0_13 = arith.constant 0 : index
    %c0_14 = arith.constant 0 : index
    %17 = vector.load %arg7[%c0_13, %c0_14] : memref<1x128xf32, #tpu.memory_space<vmem>>, vector<1x128xf32>
    %cst_15 = arith.constant dense<0.000000e+00> : vector<16xf32>
    %18 = vector.multi_reduction <add>, %15, %cst_15 [1] : vector<16x128xf32> to vector<16xf32>
    %19 = vector.shape_cast %18 : vector<16xf32> to vector<16x1xf32>
    %cst_16 = arith.constant 3.125000e-02 : f32
    %20 = vector.broadcast %cst_16 : f32 to vector<16x1xf32>
    %21 = arith.mulf %19, %20 : vector<16x1xf32>
    %22 = vector.broadcast %21 : vector<16x1xf32> to vector<16x128xf32>
    %23 = arith.subf %15, %22 : vector<16x128xf32>
    %24 = tpu.iota {dimensions = array<i32: 1>} : vector<1x128xi32>
    %c32_i32 = arith.constant 32 : i32
    %25 = vector.broadcast %c32_i32 : i32 to vector<1x128xi32>
    %26 = arith.cmpi slt, %24, %25 : vector<1x128xi32>
    %cst_17 = arith.constant 0.000000e+00 : f32
    %27 = vector.shape_cast %26 : vector<1x128xi1> to vector<1x128xi1>
    %28 = vector.broadcast %27 : vector<1x128xi1> to vector<16x128xi1>
    %29 = vector.broadcast %cst_17 : f32 to vector<16x128xf32>
    %30 = arith.select %28, %23, %29 : vector<16x128xi1>, vector<16x128xf32>
    %31 = arith.mulf %30, %30 : vector<16x128xf32>
    %cst_18 = arith.constant dense<0.000000e+00> : vector<16xf32>
    %32 = vector.multi_reduction <add>, %31, %cst_18 [1] : vector<16x128xf32> to vector<16xf32>
    %33 = vector.shape_cast %32 : vector<16xf32> to vector<16x1xf32>
    %cst_19 = arith.constant 3.125000e-02 : f32
    %34 = vector.broadcast %cst_19 : f32 to vector<16x1xf32>
    %35 = arith.mulf %33, %34 : vector<16x1xf32>
    %cst_20 = arith.constant 9.99999974E-6 : f32
    %36 = vector.broadcast %cst_20 : f32 to vector<16x1xf32>
    %37 = arith.addf %35, %36 : vector<16x1xf32>
    %38 = math.rsqrt %37 : vector<16x1xf32>
    %39 = vector.broadcast %38 : vector<16x1xf32> to vector<16x128xf32>
    %40 = arith.mulf %30, %39 : vector<16x128xf32>
    %41 = vector.broadcast %16 : vector<1x128xf32> to vector<16x128xf32>
    %42 = arith.mulf %40, %41 : vector<16x128xf32>
    %43 = vector.broadcast %17 : vector<1x128xf32> to vector<16x128xf32>
    %44 = arith.addf %42, %43 : vector<16x128xf32>
    %c0_21 = arith.constant 0 : index
    %c0_22 = arith.constant 0 : index
    %45 = vector.load %arg8[%c0_21, %c0_22] : memref<16x128xf32, #tpu.memory_space<vmem>>, vector<16x128xf32>
    tpu.vector_store %arg8[%c0_21, %c0_22], %44 {strides = array<i32>} : memref<16x128xf32, #tpu.memory_space<vmem>>, vector<16x128xf32>,
    return
  }
  func.func @transform_0(%arg0: i32) -> (i32, i32) {
    %c0_i32 = arith.constant 0 : i32
    %c0_i32_0 = arith.constant 0 : i32
    return %arg0, %c0_i32 : i32, i32
  }
  func.func @transform_1(%arg0: i32) -> (i32, i32) {
    %c0_i32 = arith.constant 0 : i32
    %c0_i32_0 = arith.constant 0 : i32
    %c0_i32_1 = arith.constant 0 : i32
    return %c0_i32, %c0_i32_0 : i32, i32
  }
  func.func @transform_2(%arg0: i32) -> (i32, i32) {
    %c0_i32 = arith.constant 0 : i32
    %c0_i32_0 = arith.constant 0 : i32
    %c0_i32_1 = arith.constant 0 : i32
    return %c0_i32, %c0_i32_0 : i32, i32
  }
  func.func @transform_3(%arg0: i32) -> (i32, i32) {
    %c0_i32 = arith.constant 0 : i32
    %c0_i32_0 = arith.constant 0 : i32
    %c0_i32_1 = arith.constant 0 : i32
    return %c0_i32, %c0_i32_0 : i32, i32
  }
  func.func @transform_4(%arg0: i32) -> (i32, i32) {
    %c0_i32 = arith.constant 0 : i32
    %c0_i32_0 = arith.constant 0 : i32
    %c0_i32_1 = arith.constant 0 : i32
    return %c0_i32, %c0_i32_0 : i32, i32
  }
  func.func @transform_5(%arg0: i32) -> (i32, i32) {
    %c0_i32 = arith.constant 0 : i32
    %c0_i32_0 = arith.constant 0 : i32
    %c0_i32_1 = arith.constant 0 : i32
    return %c0_i32, %c0_i32_0 : i32, i32
  }
  func.func @transform_6(%arg0: i32) -> (i32, i32) {
    %c0_i32 = arith.constant 0 : i32
    %c0_i32_0 = arith.constant 0 : i32
    %c0_i32_1 = arith.constant 0 : i32
    return %c0_i32, %c0_i32_0 : i32, i32
  }
  func.func @transform_7(%arg0: i32) -> (i32, i32) {
    %c0_i32 = arith.constant 0 : i32
    %c0_i32_0 = arith.constant 0 : i32
    return %arg0, %c0_i32 : i32, i32
  }
}

</mosaic_0001>

<bundles_post_ra>
// kernel: position_wise_feed_forward.1
= control target key start
LH: loop header
LB: loop body
LE: loop exit
PB: predicated region body
PF: predicated region fallthrough
CT: control target
= control target key end

     0   :  { %12 = vsyncpa [#allocation3], 0  ;;  %s566_s0 = inlined_call_operand.vmem [shape: f32[16,128], index: 0, kind: input, shape index: {}, may-alias: {0,7}]   ;;  %s567_s1 = inlined_call_operand.hbm [shape: bf16[128,128], index: 1, kind: input, shape index: {}]   ;;  %s568_s2 = inlined_call_operand.vmem [shape: f32[1,128], index: 2, kind: input, shape index: {}]   ;;  %s569_s3 = inlined_call_operand.hbm [shape: bf16[128,128], index: 3, kind: input, shape index: {}]   ;;  %s570_s4 = inlined_call_operand.vmem [shape: f32[1,128], index: 4, kind: input, shape index: {}]   ;;  %s571_s5 = inlined_call_operand.vmem [shape: f32[1,128], index: 5, kind: input, shape index: {}]   ;;  %s572_s6 = inlined_call_operand.vmem [shape: f32[1,128], index: 6, kind: input, shape index: {}]   ;;  %s573_s7 = inlined_call_operand.vmem [shape: f32[16,128], index: 7, kind: output, shape index: {}, may-alias: {0,7}]  }
   0x1   :  { %13 = vsyncpa [#allocation5], 0  ;;  %s490_s24 = smov [#allocation2]  }
   0x2   :  { %s21_s25 = sshll.u32 %s490_s24, 4  ;;  %s22_s25 = int_to_ptr.vmem [resolvable:$true] %s21_s25 }
   0x3   :  { %s454_s26 = scalar_lea.vmem %s22_s25, 1024  ;;  %p459_p1 = scmp.lt.s32.totalorder %s22_s25, %s22_s25 }
   0x4   :  { %p455_p0 = scmp.ne.s32.totalorder %s22_s25, %s454_s26  ;;  %p460_p2 = scmp.lt.s32.totalorder %s454_s26, %s454_s26 }
   0x6   :  { %p461_p3 = por %p460_p2, %p459_p1 }
   0x8   :  { %p462_p4 = pnand %p461_p3, %p455_p0 }
   0xa   :  { %465 = shalt.err (!%p462_p4)
}
   0xb   :  { %s491_s27 = smov 64   ;;  %s492_s28 = smov 4  }
   0xc   :  { %27 = dma.hbm_to_vmem [thread:$0]  %s567_s1, 1024, %s22_s25, [#allocation3], %s491_s27, %s491_s27, %s492_s28  }
   0xd   :  { %s493_s8 = smov [#allocation4]  }
   0xe   :  { %s35_s9 = sshll.u32 %s493_s8, 4  ;;  %s36_s9 = int_to_ptr.vmem [resolvable:$true] %s35_s9 }
   0xf   :  { %s474_s10 = scalar_lea.vmem %s36_s9, 1024  ;;  %p479_p6 = scmp.lt.s32.totalorder %s36_s9, %s36_s9 }
  0x10   :  { %p475_p5 = scmp.ne.s32.totalorder %s36_s9, %s474_s10  ;;  %p480_p7 = scmp.lt.s32.totalorder %s474_s10, %s474_s10 }
  0x12   :  { %p481_p8 = por %p480_p7, %p479_p6 }
  0x14   :  { %p482_p9 = pnand %p481_p8, %p475_p5 }
  0x16   :  { %485 = shalt.err (!%p482_p9)
}
  0x17   :  { %41 = dma.hbm_to_vmem [thread:$0]  %s569_s3, 1024, %s36_s9, [#allocation5], %s491_s27, %s491_s27, %s492_s28  }
  0x18   :  { %486 = dma.done.wait [#allocation3], 1024  }
  0x19   :  { %487 = vsyncadd [#allocation3], 4294966272 }
  0x1a   :  { %488 = dma.done.wait [#allocation5], 1024  }
  0x1b   :  { %489 = vsyncadd [#allocation5], 4294966272  ;;  %v494_v0 = vmov 0.0   ;;  %vm495_vm0 = vmmov 0   ;;  %v426_v1 = vld [vmem:[#allocation2 + $0x38] sm:$0xff]   ;;  %v427_v2 = vld [vmem:[#allocation2 + $0x30] sm:$0xff]   ;;  %v297_v39 = vlaneseq }
  0x1c   :  { %380 = vmatprep.subr.bf16.mxu0 %v494_v0  ;;  %396 = vmatprep.mubr.msk.bf16.mxu0 %vm495_vm0, %v494_v0  ;;  %v428_v3 = vld [vmem:[#allocation2 + $0x28] sm:$0xff]   ;;  %v434_v4 = vld [vmem:[#allocation4 + $0x38] sm:$0xff]   ;;  %v429_v5 = vld [vmem:[#allocation2 + $0x20] sm:$0xff]  }
  0x1d   :  { %400 = vmatprep.subr.bf16.mxu1 %v494_v0  ;;  %416 = vmatprep.mubr.msk.bf16.mxu1 %vm495_vm0, %v494_v0  ;;  %v435_v6 = vld [vmem:[#allocation4 + $0x30] sm:$0xff]   ;;  %v430_v7 = vld [vmem:[#allocation2 + $0x18] sm:$0xff]   ;;  %v436_v8 = vld [vmem:[#allocation4 + $0x28] sm:$0xff]   ;;  %v298_v40 = vand.u32 127, %v297_v39 }
  0x1e   :  { %381 = vmatpush3.bf16.msra.mxu0 %v426_v1  ;;  %401 = vmatpush3.bf16.msra.mxu1 %v434_v4  ;;  %v431_v9 = vld [vmem:[#allocation2 + $0x10] sm:$0xff]   ;;  %v437_v10 = vld [vmem:[#allocation4 + $0x20] sm:$0xff]   ;;  %v432_v11 = vld [vmem:[#allocation2 + $0x8] sm:$0xff]  }
  0x1f   :  { %382 = vmatprep.subr.bf16.mxu0 %v494_v0  ;;  %402 = vmatprep.subr.bf16.mxu1 %v494_v0  ;;  %v438_v12 = vld [vmem:[#allocation4 + $0x18] sm:$0xff]   ;;  %v433_v13 = vld [vmem:[#allocation2] sm:$0xff]   ;;  %v56_v15 = vld [vmem:[%s566_s0 + $0x8] sm:$0xff]  ;;  %vm299_vm1 = vcmp.lt.s32.totalorder %v298_v40, 32 }
  0x20   :  { %v55_v14 = vld [vmem:[%s566_s0] sm:$0xff]  ;;  %v439_v17 = vld [vmem:[#allocation4 + $0x10] sm:$0xff]   ;;  %v440_v18 = vld [vmem:[#allocation4 + $0x8] sm:$0xff]  }
  0x21   :  { %v57_v16 = vpack.c.bf16 %v56_v15, %v55_v14  ;;  %v441_v19 = vld [vmem:[#allocation4] sm:$0xff]  }
  0x22   :  { %383 = vmatpush3.bf16.msra.mxu0 %v427_v2  ;;  %403 = vmatpush3.bf16.msra.mxu1 %v435_v6  ;;  %v342_v20 = vld [vmem:[%s568_s2] ss:$0 sm:$0xff] }
  0x23   :  { %384 = vmatprep.subr.bf16.mxu0 %v494_v0  ;;  %404 = vmatprep.subr.bf16.mxu1 %v494_v0  ;;  %v359_v31 = vld [vmem:[%s570_s4] ss:$0 sm:$0xff] }
  0x24   :  { %v360_v58 = vld [vmem:[%s571_s5] ss:$0 sm:$0xff] }
  0x25   :  { %v361_v60 = vld [vmem:[%s572_s6] ss:$0 sm:$0xff] }
  0x26   :  { %385 = vmatpush3.bf16.msra.mxu0 %v428_v3  ;;  %405 = vmatpush3.bf16.msra.mxu1 %v436_v8 }
  0x27   :  { %386 = vmatprep.subr.bf16.mxu0 %v494_v0  ;;  %406 = vmatprep.subr.bf16.mxu1 %v494_v0 }
  0x2a   :  { %387 = vmatpush3.bf16.msra.mxu0 %v429_v5  ;;  %407 = vmatpush3.bf16.msra.mxu1 %v437_v10 }
  0x2b   :  { %388 = vmatprep.subr.bf16.mxu0 %v494_v0  ;;  %408 = vmatprep.subr.bf16.mxu1 %v494_v0 }
  0x2e   :  { %389 = vmatpush3.bf16.msra.mxu0 %v430_v7  ;;  %409 = vmatpush3.bf16.msra.mxu1 %v438_v12 }
  0x2f   :  { %390 = vmatprep.subr.bf16.mxu0 %v494_v0  ;;  %410 = vmatprep.subr.bf16.mxu1 %v494_v0 }
  0x32   :  { %391 = vmatpush3.bf16.msra.mxu0 %v431_v9  ;;  %411 = vmatpush3.bf16.msra.mxu1 %v439_v17 }
  0x33   :  { %392 = vmatprep.subr.bf16.mxu0 %v494_v0  ;;  %412 = vmatprep.subr.bf16.mxu1 %v494_v0 }
  0x36   :  { %393 = vmatpush3.bf16.msra.mxu0 %v432_v11  ;;  %413 = vmatpush3.bf16.msra.mxu1 %v440_v18 }
  0x37   :  { %394 = vmatprep.subr.bf16.mxu0 %v494_v0  ;;  %414 = vmatprep.subr.bf16.mxu1 %v494_v0 }
  0x3a   :  { %395 = vmatpush3.bf16.msra.mxu0 %v433_v13  ;;  %415 = vmatpush3.bf16.msra.mxu1 %v441_v19 }
  0x3d   :  { %397 = vmatmul.mubr.bf16.vlgmr.msra.gmra.mxu0 %v57_v16 }
  0xfd   :  { %v163_v21 = vpop.f32.mrf.mxu0 }
  0xfe   :  { %v164_v23 = vadd.f32 %v342_v20, %v163_v21 }
  0xff   :  { %v398_v22 = vpop.f32.mrf.mxu0 }
 0x100   :  { %v170_v27 = vmax.f32 %v164_v23, 0.0 }
 0x101   :  { %v166_v24 = vpop.f32.mrf.mxu0 }
 0x102   :  { %v167_v25 = vadd.f32 %v342_v20, %v166_v24 }
 0x103   :  { %v399_v26 = vpop.f32.mrf.mxu0 }
 0x104   :  { %v171_v28 = vmax.f32 %v167_v25, 0.0 }
 0x106   :  { %v172_v29 = vpack.c.bf16 %v171_v28, %v170_v27 }
 0x108   :  { %417 = vmatmul.mubr.bf16.vlgmr.msra.gmra.mxu1 %v172_v29 }
 0x1c8   :  { %v271_v30 = vpop.f32.mrf.mxu1 }
 0x1c9   :  { %v272_v32 = vadd.f32 %v271_v30, %v55_v14 }
 0x1ca   :  { %v418_v33 = vpop.f32.mrf.mxu1 }
 0x1cb   :  { %v285_v34 = vadd.f32 %v359_v31, %v272_v32 }
 0x1cc   :  { %v274_v35 = vpop.f32.mrf.mxu1 }
 0x1cd   :  { %v275_v36 = vadd.f32 %v274_v35, %v56_v15  ;;  %289 = vadd.xlane.f32.xlu0 %v285_v34 }
 0x1ce   :  { %v419_v37 = vpop.f32.mrf.mxu1 }
 0x1cf   :  { %v286_v38 = vadd.f32 %v359_v31, %v275_v36 }
 0x1d1   :  { %291 = vadd.xlane.f32.xlu0 %v286_v38 }
 0x256   :  { %v290_v41 = vpop.xlane.xlu0 %289 }
 0x257   :  { %v293_v42 = vmul.f32 0.03125, %v290_v41 }
 0x259   :  { %v295_v43 = vsub.f32 %v285_v34, %v293_v42 }
 0x25a   :  { %v292_v44 = vpop.xlane.xlu0 %291 }
 0x25b   :  { %v294_v45 = vmul.f32 0.03125, %v292_v44  ;;  %v302_v46 = vsel %vm299_vm1, %v295_v43, 0.0 }
 0x25c   :  { %v304_v47 = vmul.f32 %v302_v46, %v302_v46 }
 0x25d   :  { %v296_v48 = vsub.f32 %v286_v38, %v294_v45 }
 0x25e   :  { %306 = vadd.xlane.f32.xlu1 %v304_v47 }
 0x25f   :  { %v303_v49 = vsel %vm299_vm1, %v296_v48, 0.0 }
 0x260   :  { %v305_v50 = vmul.f32 %v303_v49, %v303_v49 }
 0x262   :  { %308 = vadd.xlane.f32.xlu1 %v305_v50 }
 0x2e7   :  { %v307_v51 = vpop.xlane.xlu1 %306 }
 0x2e8   :  { %v310_v52 = vmul.f32 0.03125, %v307_v51 }
 0x2ea   :  { %v312_v53 = vadd.f32 1e-05, %v310_v52 }
 0x2eb   :  { %v309_v54 = vpop.xlane.xlu1 %308 }
 0x2ec   :  { %442 = vrsqrt.f32 %v312_v53  ;;  %v311_v55 = vmul.f32 0.03125, %v309_v54 }
 0x2ee   :  { %v313_v56 = vadd.f32 1e-05, %v311_v55 }
 0x2f0   :  { %444 = vrsqrt.f32 %v313_v56 }
 0x2f9   :  { %v443_v57 = vpop.eup %442 }
 0x2fa   :  { %v316_v59 = vmul.f32 %v443_v57, %v302_v46 }
 0x2fc   :  { %v324_v61 = vmul.f32 %v360_v58, %v316_v59 }
 0x2fd   :  { %v445_v62 = vpop.eup %444 }
 0x2fe   :  { %v332_v63 = vadd.f32 %v361_v60, %v324_v61  ;;  %v317_v0 = vmul.f32 %v445_v62, %v303_v49 }
 0x300   :  { %334 = vst [vmem:[%s573_s7] sm:$0xff] %v332_v63  ;;  %v325_v1 = vmul.f32 %v360_v58, %v317_v0 }
 0x302   :  { %v333_v2 = vadd.f32 %v361_v60, %v325_v1 }
 0x304   :  { %335 = vst [vmem:[%s573_s7 + $0x8] sm:$0xff] %v333_v2 }
 0x305   :  { %340 = vsyncpa [#allocation3], 1 }
 0x306   :  { %341 = vsyncpa [#allocation5], 1 }

</bundles_post_ra>
